<compile_context>
chip_gen: v6e
topology: v6e:2x2x1
jax: 0.10.0
libtpu: 0.0.40
codegen_flags: <defaults>
</compile_context>

<pallas_src>
import jax
import jax.numpy as jnp
from jax.experimental import pallas as pl
from jax.experimental.pallas import tpu as pltpu


def _endblock_kernel(x_ref, w_ref, b_ref, o_ref):
    # x_ref: (TN, C, H*W)   w_ref: (C, 10) pre-scaled by 1/(H*W)
    # b_ref: (1, 10)        o_ref: (TN, 10)
    pooled_sum = jnp.sum(x_ref[...], axis=-1)            # (TN, C) lane reduction
    out = jnp.dot(pooled_sum, w_ref[...],
                  preferred_element_type=jnp.float32) + b_ref[...]
    o_ref[...] = out.astype(o_ref.dtype)


def _choose_batch_tile(n, c, hw, target_bytes):
    """Pick TN so one x block is ~target_bytes (few MiB), VMEM-friendly."""
    rows = max(1, target_bytes // (c * hw * 4))
    if rows >= n:
        return n                       # full extent -> always a legal block
    # Output block is (TN, 10): TN is its sublane dim, so keep it a multiple of 8
    # whenever it is not the full batch extent.
    tn = max(8, (rows // 8) * 8)
    if tn >= n:
        return n
    return tn


def endblock_forward(x_nchw, weight, bias, *, target_block_bytes=4 << 20):
    """x_nchw: (N, C, H, W) f32; weight: (num_classes, C); bias: (num_classes,)."""
    N, C, H, W = x_nchw.shape
    hw = H * W
    num_classes = weight.shape[0]

    # Wrapper-side layout plumbing (free): flatten spatial, fold mean scale into
    # the weight and pre-transpose it to (C, num_classes) so the kernel never
    # transposes on the XLU.
    x_flat = x_nchw.reshape(N, C, hw).astype(jnp.float32)
    w_ct = (weight.astype(jnp.float32) / float(hw)).T     # (C, num_classes)
    b2d = bias.reshape(1, -1).astype(jnp.float32)         # (1, num_classes)

    tn = _choose_batch_tile(N, C, hw, target_block_bytes)
    grid = (pl.cdiv(N, tn),)

    # Advisory cost hint: this kernel is purely HBM-bandwidth bound on the x read.
    cost = pl.CostEstimate(
        flops=2 * N * C * (hw + num_classes),
        transcendentals=0,
        bytes_accessed=N * C * hw * 4 + C * num_classes * 4 + N * num_classes * 4,
    )

    out = pl.pallas_call(
        _endblock_kernel,
        out_shape=jax.ShapeDtypeStruct((N, num_classes), jnp.float32),
        grid_spec=pltpu.PrefetchScalarGridSpec(
            num_scalar_prefetch=0,
            grid=grid,
            in_specs=[
                # x: tile only the batch axis; keep (C, H*W) full extent so the
                # last-two-dims (8,128)-or-full-extent rule is always satisfied.
                pl.BlockSpec((tn, C, hw), lambda i: (i, 0, 0)),
                # Weight / bias: same block every step -> VMEM-resident.
                pl.BlockSpec((C, num_classes), lambda i: (0, 0)),
                pl.BlockSpec((1, num_classes), lambda i: (0, 0)),
            ],
            out_specs=pl.BlockSpec((tn, num_classes), lambda i: (i, 0)),
        ),
        compiler_params=pltpu.CompilerParams(
            # Batch-parallel grid axis: sharded across v7x's 2 TensorCores,
            # neutral on v5e/v6e.
            dimension_semantics=("parallel",),
            # Explicit budget so double-buffered few-MiB blocks fit comfortably
            # even on v7x (64 MiB physical / 32 MiB scoped default).
            vmem_limit_bytes=64 << 20,
        ),
        cost_estimate=cost,
    )(x_flat, w_ct, b2d)
    return out


if __name__ == "__main__":
    # Small shapes consistent with the module: batch=2, in_planes=4, spatial=16.
    N, C, H, W = 2, 4, 16, 16
    NUM_CLASSES = 10

    key = jax.random.PRNGKey(0)
    kx, kw, kb = jax.random.split(key, 3)

    x = jax.random.normal(kx, (N, C, H, W), dtype=jnp.float32)
    # Deterministic parameter init (synthetic; mimics nn.Linear(in_planes, 10) shapes).
    fc_weight = jax.random.normal(kw, (NUM_CLASSES, C), dtype=jnp.float32) * 0.1
    fc_bias = jax.random.normal(kb, (NUM_CLASSES,), dtype=jnp.float32) * 0.1

    out = endblock_forward(x, fc_weight, fc_bias)
    out = jax.block_until_ready(out)

    # Pure-JAX reference for sanity check.
    pooled_ref = jnp.mean(x, axis=(2, 3))
    ref = pooled_ref @ fc_weight.T + fc_bias
    assert out.shape == (N, NUM_CLASSES)
    assert jnp.allclose(out, ref, atol=1e-5, rtol=1e-5)

    print("KERNEL_OK")
</pallas_src>

<mosaic_0001>
module attributes {stable_mosaic.version = 11 : i64} {
  func.func @_endblock_kernel(%arg0: i32, %arg1: memref<2x4x256xf32, #tpu.memory_space<vmem>>, %arg2: memref<4x10xf32, #tpu.memory_space<vmem>>, %arg3: memref<1x10xf32, #tpu.memory_space<vmem>>, %arg4: memref<2x10xf32, #tpu.memory_space<vmem>>) attributes {dimension_semantics = [#tpu.dimension_semantics<parallel>], iteration_bounds = array<i64: 1>, scalar_prefetch = 0 : i64, scratch_operands = 0 : i64, tpu.core_type = #tpu.core_type<tc>, window_params = [{transform_indices = @transform_0, window_bounds = array<i64: 2, 4, 256>}, {pipeline_mode = #tpu.pipeline_mode<synchronous>, transform_indices = @transform_1, window_bounds = array<i64: 4, 10>}, {pipeline_mode = #tpu.pipeline_mode<synchronous>, transform_indices = @transform_2, window_bounds = array<i64: 1, 10>}, {transform_indices = @transform_3, window_bounds = array<i64: 2, 10>}]} {
    %c0 = arith.constant 0 : index
    %c0_0 = arith.constant 0 : index
    %c0_1 = arith.constant 0 : index
    %0 = vector.load %arg1[%c0, %c0_0, %c0_1] : memref<2x4x256xf32, #tpu.memory_space<vmem>>, vector<2x4x256xf32>
    %cst = arith.constant dense<0.000000e+00> : vector<2x4xf32>
    %1 = vector.multi_reduction <add>, %0, %cst [2] : vector<2x4x256xf32> to vector<2x4xf32>
    %c0_2 = arith.constant 0 : index
    %c0_3 = arith.constant 0 : index
    %2 = vector.load %arg2[%c0_2, %c0_3] : memref<4x10xf32, #tpu.memory_space<vmem>>, vector<4x10xf32>
    %cst_4 = arith.constant dense<0.000000e+00> : vector<2x10xf32>
    %3 = tpu.matmul %1, %2, %cst_4 {dimension_numbers = #tpu.dot_dimension_numbers<[1], [0], [0], [1], [0, 0, 1, 1], [], []>} : vector<2x4xf32>, vector<4x10xf32>, vector<2x10xf32> -> vector<2x10xf32>
    %c0_5 = arith.constant 0 : index
    %c0_6 = arith.constant 0 : index
    %4 = vector.load %arg3[%c0_5, %c0_6] : memref<1x10xf32, #tpu.memory_space<vmem>>, vector<1x10xf32>
    %5 = vector.broadcast %4 : vector<1x10xf32> to vector<2x10xf32>
    %6 = arith.addf %3, %5 : vector<2x10xf32>
    %c0_7 = arith.constant 0 : index
    %c0_8 = arith.constant 0 : index
    %7 = vector.load %arg4[%c0_7, %c0_8] : memref<2x10xf32, #tpu.memory_space<vmem>>, vector<2x10xf32>
    tpu.vector_store %arg4[%c0_7, %c0_8], %6 {strides = array<i32>} : memref<2x10xf32, #tpu.memory_space<vmem>>, vector<2x10xf32>,
    return
  }
  func.func @transform_0(%arg0: i32) -> (i32, i32, i32) {
    %c0_i32 = arith.constant 0 : i32
    %c0_i32_0 = arith.constant 0 : i32
    %c0_i32_1 = arith.constant 0 : i32
    return %arg0, %c0_i32, %c0_i32_0 : i32, i32, i32
  }
  func.func @transform_1(%arg0: i32) -> (i32, i32) {
    %c0_i32 = arith.constant 0 : i32
    %c0_i32_0 = arith.constant 0 : i32
    %c0_i32_1 = arith.constant 0 : i32
    return %c0_i32, %c0_i32_0 : i32, i32
  }
  func.func @transform_2(%arg0: i32) -> (i32, i32) {
    %c0_i32 = arith.constant 0 : i32
    %c0_i32_0 = arith.constant 0 : i32
    %c0_i32_1 = arith.constant 0 : i32
    return %c0_i32, %c0_i32_0 : i32, i32
  }
  func.func @transform_3(%arg0: i32) -> (i32, i32) {
    %c0_i32 = arith.constant 0 : i32
    %c0_i32_0 = arith.constant 0 : i32
    return %arg0, %c0_i32 : i32, i32
  }
}

</mosaic_0001>

<bundles_post_ra>
// kernel: tpu_custom_call.1
= control target key start
LH: loop header
LB: loop body
LE: loop exit
PB: predicated region body
PF: predicated region fallthrough
CT: control target
= control target key end

     0   :  { %8 = vsyncpa [#allocation3], 0  ;;  %s305_s0 = inlined_call_operand.hbm [shape: f32[2,4,256], index: 0, kind: input, shape index: {}]   ;;  %s306_s1 = inlined_call_operand.hbm [shape: f32[4,10], index: 1, kind: input, shape index: {}]   ;;  %s307_s2 = inlined_call_operand.vmem [shape: f32[1,10], index: 2, kind: input, shape index: {}]   ;;  %s308_s3 = inlined_call_operand.hbm [shape: f32[2,10], index: 3, kind: output, shape index: {}]  }
   0x1   :  { %9 = vsyncpa [#allocation6], 0 }
   0x2   :  { %10 = vsyncpa [#allocation4], 0  ;;  %s261_s12 = smov [#allocation2]  }
   0x3   :  { %s16_s13 = sshll.u32 %s261_s12, 4  ;;  %s17_s13 = int_to_ptr.vmem [resolvable:$true] %s16_s13 }
   0x4   :  { %s203_s14 = scalar_lea.vmem %s17_s13, 256  ;;  %p208_p1 = scmp.lt.s32.totalorder %s17_s13, %s17_s13 }
   0x5   :  { %p204_p0 = scmp.ne.s32.totalorder %s17_s13, %s203_s14  ;;  %p209_p2 = scmp.lt.s32.totalorder %s203_s14, %s203_s14 }
   0x7   :  { %p210_p3 = por %p209_p2, %p208_p1 }
   0x9   :  { %p211_p4 = pnand %p210_p3, %p204_p0 }
   0xb   :  { %214 = shalt.err (!%p211_p4)
}
   0xc   :  { %s262_s15 = smov 128   ;;  %s263_s16 = smov 8  }
   0xd   :  { %22 = dma.hbm_to_vmem [thread:$0]  %s305_s0, 256, %s17_s13, [#allocation3], %s262_s15, %s262_s15, %s263_s16  }
   0xe   :  { %s264_s19 = smov [#allocation5]  }
   0xf   :  { %s29_s20 = sshll.u32 %s264_s19, 4  ;;  %s30_s20 = int_to_ptr.vmem [resolvable:$true] %s29_s20 }
  0x10   :  { %s223_s21 = scalar_lea.vmem %s30_s20, 64  ;;  %p228_p6 = scmp.lt.s32.totalorder %s30_s20, %s30_s20 }
  0x11   :  { %p224_p5 = scmp.ne.s32.totalorder %s30_s20, %s223_s21  ;;  %p229_p7 = scmp.lt.s32.totalorder %s223_s21, %s223_s21 }
  0x13   :  { %p230_p8 = por %p229_p7, %p228_p6 }
  0x15   :  { %p231_p9 = pnand %p230_p8, %p224_p5 }
  0x17   :  { %234 = shalt.err (!%p231_p9)
}
  0x18   :  { %32 = dma.hbm_to_vmem [thread:$0]  %s306_s1, 64, %s30_s20, [#allocation6]  }
  0x19   :  { %255 = dma.done.wait [#allocation3], 256  }
  0x1a   :  { %256 = vsyncadd [#allocation3], 4294967040 }
  0x1b   :  { %257 = dma.done.wait [#allocation6], 64  }
  0x1c   :  { %258 = vsyncadd [#allocation6], 4294967232  ;;  %vm49_vm0 = vcmask 1043456   ;;  %v41_v0 = vld [vmem:[#allocation2] sm:$0xff]  ;;  %v42_v1 = vld [vmem:[#allocation2 + $0x8] sm:$0xff]  ;;  %v265_v11 = vmov 0.0   ;;  %v70_v12 = vlaneseq }
  0x1d   :  { %v45_v2 = vcombine.high %v41_v0, %v41_v0  ;;  %v50_v3 = vsel %vm49_vm0, %v41_v0, 0.0  ;;  %v46_v4 = vcombine.high %v42_v1, %v42_v1  ;;  %v55_v6 = vsel %vm49_vm0, %v42_v1, 0.0  ;;  %v60_v10 = vld [vmem:[#allocation5] sm:$0xf]  ;;  %181 = vmatprep.subr.mxu0 %v265_v11  ;;  %v176_v21 = vld [vmem:[%s307_s2] ss:$0 sm:$0xff] }
  0x1e   :  { %vm266_vm1 = vmmov 0   ;;  %182 = vmatpush3.msk.msra.mxu0 %vm49_vm0, %v60_v10  ;;  %v71_v13 = vand.u32 127, %v70_v12  ;;  %v73_v14 = vshrl.u32 %v70_v12, 7  ;;  %vm80_vm2 = vcmask 1041409   ;;  %s267_s24 = smov [#allocation7]  }
  0x1f   :  { %v51_v5 = vsel %vm49_vm0, %v45_v2, 0.0  ;;  %v56_v7 = vsel %vm49_vm0, %v46_v4, 0.0  ;;  %183 = vmatprep.mubr.msk.f32.mxu0 %vm266_vm1, %v265_v11  ;;  %vm82_vm3 = vcmask 31744   ;;  %s166_s25 = sshll.u32 %s267_s24, 4  ;;  %vm158_vm4 = vcmask 74752   ;;  %s167_s25 = int_to_ptr.vmem [resolvable:$true] %s166_s25 }
  0x20   :  { %v52_v8 = vadd.f32 %v51_v5, %v50_v3  ;;  %v57_v9 = vadd.f32 %v56_v7, %v55_v6  ;;  %v74_v16 = vsub.s32 %v71_v13, %v73_v14  ;;  %s235_s26 = scalar_lea.vmem %s167_s25, 32  ;;  %p240_p11 = scmp.lt.s32.totalorder %s167_s25, %s167_s25 }
  0x21   :  { %p236_p10 = scmp.ne.s32.totalorder %s167_s25, %s235_s26  ;;  %p241_p12 = scmp.lt.s32.totalorder %s235_s26, %s235_s26 }
  0x22   :  { %53 = vadd.xlane.f32.xlu0 %v52_v8 }
  0x23   :  { %p242_p13 = por %p241_p12, %p240_p11 }
  0x25   :  { %p243_p0 = pnand %p242_p13, %p236_p10 }
  0x26   :  { %58 = vadd.xlane.f32.xlu0 %v57_v9 }
  0xab   :  { %v54_v15 = vpop.xlane.xlu0 %53 }
  0xac   :  { %v75_v18 = vrot.slane %v54_v15, %v74_v16 }
  0xaf   :  { %v59_v17 = vpop.xlane.xlu0 %58 }
  0xb0   :  { %v79_v19 = vrot.slane %v59_v17, %v74_v16 }
  0xb2   :  { %v81_v20 = vsel %vm80_vm2, %v79_v19, %v75_v18 }
  0xb3   :  { %184 = vmatmul.mubr.msk.f32.vlgmr.msra.gmra.mxu0 %vm82_vm3, %v81_v20 }
 0x173   :  { %v154_v22 = vpop.f32.mrf.mxu0 }
 0x174   :  { %v155_v23 = vadd.f32 %v176_v21, %v154_v22 }
 0x175   :  { %v185_v24 = vpop.f32.mrf.mxu0 }
 0x176   :  { %159 = vst.msk [vmem:[#allocation7] sm:$0x3] %vm158_vm4, %v155_v23 }
 0x177   :  { %246 = shalt.err (!%p243_p0)
}
 0x178   :  { %169 = dma.vmem_to_hbm [thread:$0]  %s167_s25, 32, %s308_s3, [#allocation4]  }
 0x179   :  { %259 = dma.done.wait [#allocation4], 32  }
 0x17a   :  { %260 = vsyncadd [#allocation4], 4294967264 }
 0x17b   :  { %173 = vsyncpa [#allocation3], 1 }
 0x17c   :  { %174 = vsyncpa [#allocation6], 1 }
 0x17d   :  { %175 = vsyncpa [#allocation4], 1 }

</bundles_post_ra>
